<compile_context>
chip_gen: v7x
topology: tpu7x:2x2x1
jax: 0.10.0
libtpu: 0.0.40
codegen_flags: <defaults>
</compile_context>

<pallas_src>
import functools

import jax
import jax.numpy as jnp
from jax.experimental import pallas as pl
from jax.experimental.pallas import tpu as pltpu


def _round_up(x, m):
    return (x + m - 1) // m * m


def _cdiv(a, b):
    return -(-a // b)


# ---------------------------------------------------------------------------
# Tiling heuristics.  K tiling depends only on K and N padding only on N, so
# weights can be pre-padded once at init and reused every forward pass.
# ---------------------------------------------------------------------------
def _k_tiles(K):
    """Return (tk, nk, Kp): K tile, number of K steps, padded K."""
    Kp0 = _round_up(K, 128)
    units = Kp0 // 128
    nk = _cdiv(units, 28)                      # target K tiles <= 3584
    tk = None
    for cand in range(nk, min(nk + 4, units) + 1):
        if units % cand == 0:                  # exact split -> no extra K pad
            nk, tk = cand, (units // cand) * 128
            break
    if tk is None:
        tk = _round_up(_cdiv(Kp0, nk), 128)
    return tk, nk, nk * tk


def _m_tile(M):
    if M >= 4096:
        return 1024
    if M >= 1024:
        return 512
    if M >= 256:
        return 256
    if M >= 128:
        return 128
    return _round_up(max(M, 1), 16)            # bf16-friendly sublane count


def _n_tile(Np, m_blocks):
    """Pick tn dividing Np (multiple of 128). If there is only one M block,
    split N in two so v7x's two TensorCores both get work."""
    divs = [d for d in range(128, Np + 1, 128) if Np % d == 0]
    cands = [d for d in divs if d <= 2048]
    if m_blocks < 2:
        half = [d for d in cands if d <= Np // 2]
        if half:
            cands = half
    return max(cands) if cands else max(divs)


# ---------------------------------------------------------------------------
# Pallas kernels: tiled matmul with fused bias + activation (bf16 in, f32 acc)
# ---------------------------------------------------------------------------
def _apply_act(r, act):
    if act == "relu":
        return jnp.maximum(r, 0.0)
    if act == "leaky_relu":                    # PyTorch default slope 0.01
        return jnp.where(r > 0, r, 0.01 * r)
    if act == "sigmoid":
        return jax.nn.sigmoid(r)
    return r


def _mm_kernel_single(x_ref, w_ref, b_ref, o_ref, *, act):
    # Single K step: no accumulator scratch, no zero-init, direct store.
    r = jnp.dot(x_ref[...], w_ref[...], preferred_element_type=jnp.float32)
    o_ref[...] = _apply_act(r + b_ref[...], act).astype(o_ref.dtype)


def _mm_kernel_multi(x_ref, w_ref, b_ref, o_ref, acc_ref, *, nk, act):
    k = pl.program_id(2)

    @pl.when(k == 0)
    def _():
        acc_ref[...] = jnp.zeros_like(acc_ref)

    acc_ref[...] += jnp.dot(x_ref[...], w_ref[...],
                            preferred_element_type=jnp.float32)

    @pl.when(k == nk - 1)
    def _():
        o_ref[...] = _apply_act(acc_ref[...] + b_ref[...], act).astype(o_ref.dtype)


def matmul_bias_act(x, wp, bp, n_out, act="none", out_dtype=jnp.bfloat16):
    """act(x @ W + b). x:[M,K]; wp/bp pre-padded bf16/f32 from prep_*()."""
    M, K = x.shape
    tk, nk, Kp = _k_tiles(K)
    Np = _round_up(n_out, 128)
    assert wp.shape == (Kp, Np) and bp.shape == (1, Np), (wp.shape, bp.shape)

    tm = _m_tile(M)
    m_blocks = _cdiv(M, tm)
    tn = _n_tile(Np, m_blocks)
    n_blocks = Np // tn

    # Pad K (reduction dim must be exact zeros); pad M only when it is smaller
    # than a single tile, otherwise rely on ragged-last-block write masking.
    Mp = tm if M < tm else M
    xp = x.astype(jnp.bfloat16)
    if (Mp, Kp) != (M, K):
        xp = jnp.pad(xp, ((0, Mp - M), (0, Kp - K)))

    cparams = pltpu.CompilerParams(
        dimension_semantics=(("parallel", "parallel") if nk == 1
                             else ("parallel", "parallel", "arbitrary")),
        vmem_limit_bytes=32 * 1024 * 1024)

    if nk == 1:
        out = pl.pallas_call(
            functools.partial(_mm_kernel_single, act=act),
            out_shape=jax.ShapeDtypeStruct((Mp, Np), out_dtype),
            grid_spec=pltpu.PrefetchScalarGridSpec(
                num_scalar_prefetch=0,
                grid=(m_blocks, n_blocks),
                in_specs=[
                    pl.BlockSpec((tm, tk), lambda i, j: (i, 0)),
                    pl.BlockSpec((tk, tn), lambda i, j: (0, j)),
                    pl.BlockSpec((1, tn), lambda i, j: (0, j)),
                ],
                out_specs=pl.BlockSpec((tm, tn), lambda i, j: (i, j)),
            ),
            compiler_params=cparams,
        )(xp, wp, bp)
    else:
        out = pl.pallas_call(
            functools.partial(_mm_kernel_multi, nk=nk, act=act),
            out_shape=jax.ShapeDtypeStruct((Mp, Np), out_dtype),
            grid_spec=pltpu.PrefetchScalarGridSpec(
                num_scalar_prefetch=0,
                grid=(m_blocks, n_blocks, nk),
                in_specs=[
                    pl.BlockSpec((tm, tk), lambda i, j, k: (i, k)),
                    pl.BlockSpec((tk, tn), lambda i, j, k: (k, j)),
                    pl.BlockSpec((1, tn), lambda i, j, k: (0, j)),
                ],
                out_specs=pl.BlockSpec((tm, tn), lambda i, j, k: (i, j)),
                scratch_shapes=[pltpu.VMEM((tm, tn), jnp.float32)],
            ),
            compiler_params=cparams,
        )(xp, wp, bp)

    if Mp != M or Np != n_out:
        out = out[:M, :n_out]
    return out


# ---------------------------------------------------------------------------
# One-time weight preparation (hoisted out of the forward path)
# ---------------------------------------------------------------------------
def prep_dense(w, b):
    """[K,N] weight + [N] bias -> pre-padded bf16 weight / f32 bias."""
    K, N = w.shape
    _, _, Kp = _k_tiles(K)
    Np = _round_up(N, 128)
    wp = jnp.pad(w.astype(jnp.bfloat16), ((0, Kp - K), (0, Np - N)))
    bp = jnp.pad(b.astype(jnp.float32), (0, Np - N)).reshape(1, Np)
    return wp, bp


def prep_conv(w, b):
    """Conv2d weight [O,C,kh,kw] -> [kh*kw*C, O] (NHWC im2col tap order)."""
    O, C, kh, kw = w.shape
    wm = jnp.transpose(w, (2, 3, 1, 0)).reshape(kh * kw * C, O)
    return prep_dense(wm, b)


def prep_deconv(w, b):
    """ConvTranspose2d(k=4,s=2,p=1) weight [Cin,Cout,4,4] -> sub-pixel phase
    matrix [4*Cin, 4*Cout] with rows (dy,dx,c) and cols (r,s,o)."""
    Cin, Cout, kh, kw = w.shape
    assert (kh, kw) == (4, 4)
    wm = jnp.zeros((2, 2, Cin, 2, 2, Cout), w.dtype)
    for dy in range(2):
        for dx in range(2):
            for r in range(2):
                for s in range(2):
                    wm = wm.at[dy, dx, :, r, s, :].set(
                        w[:, :, 3 - r - 2 * dy, 3 - s - 2 * dx])
    wm = wm.reshape(4 * Cin, 4 * Cout)
    bm = jnp.tile(b, 4)
    return prep_dense(wm, bm)


def prepare_params(p):
    q = {}
    for n in ("c1", "c2", "c3"):
        q[n] = prep_conv(p[n + "_w"], p[n + "_b"])
    for n in ("e1", "e2", "d1", "d2"):
        q[n] = prep_dense(p[n + "_w"], p[n + "_b"])
    for n in ("t1", "t2", "t3", "t4", "t5"):
        q[n] = prep_deconv(p[n + "_w"], p[n + "_b"])
    return q


# ---------------------------------------------------------------------------
# Conv / sub-pixel ConvTranspose glue (NHWC), GEMM on the MXU
# ---------------------------------------------------------------------------
def conv2d_nhwc(x, wp, bp, n_out, k, stride, pad, act, out_dtype=jnp.bfloat16):
    B, H, W, C = x.shape
    xp = jnp.pad(x, ((0, 0), (pad, pad), (pad, pad), (0, 0)))
    Ho = (H + 2 * pad - k) // stride + 1
    Wo = (W + 2 * pad - k) // stride + 1
    taps = []
    for i in range(k):
        for j in range(k):
            taps.append(xp[:, i:i + stride * (Ho - 1) + 1:stride,
                              j:j + stride * (Wo - 1) + 1:stride, :])
    col = jnp.concatenate(taps, axis=-1).reshape(B * Ho * Wo, k * k * C)
    out = matmul_bias_act(col, wp, bp, n_out, act, out_dtype)
    return out.reshape(B, Ho, Wo, n_out)


def deconv2x_nhwc(x, wp, bp, n_out, act, out_dtype=jnp.bfloat16):
    """ConvTranspose2d(k=4, stride=2, pad=1) via sub-pixel phase GEMM."""
    B, H, W, C = x.shape
    Cout = n_out // 4
    P = jnp.pad(x, ((0, 0), (1, 1), (1, 1), (0, 0)))
    taps = [P[:, dy:dy + H + 1, dx:dx + W + 1, :]
            for dy in range(2) for dx in range(2)]
    col = jnp.concatenate(taps, axis=-1).reshape(B * (H + 1) * (W + 1), 4 * C)
    R = matmul_bias_act(col, wp, bp, n_out, act, out_dtype)
    R = R.reshape(B, H + 1, W + 1, 2, 2, Cout)
    rows = []
    for r in range(2):
        cols = [R[:, r:r + H, s:s + W, r, s, :] for s in range(2)]
        rows.append(jnp.stack(cols, axis=3))            # [B, H, W, 2, Cout]
    ph = jnp.stack(rows, axis=2)                        # [B, H, 2, W, 2, Cout]
    return ph.reshape(B, 2 * H, 2 * W, Cout)


# ---------------------------------------------------------------------------
# AutoEncoderNew forward (NCHW in / NCHW out, NHWC internally)
# ---------------------------------------------------------------------------
@jax.jit
def autoencoder_forward(x, q):
    B = x.shape[0]
    h = jnp.transpose(x, (0, 2, 3, 1)).astype(jnp.bfloat16)         # NHWC
    h = conv2d_nhwc(h, *q["c1"], 128, 5, 1, 1, "leaky_relu")        # 26x26
    h = conv2d_nhwc(h, *q["c2"], 256, 3, 2, 1, "leaky_relu")        # 13x13
    h = conv2d_nhwc(h, *q["c3"], 512, 3, 2, 1, "leaky_relu")        # 7x7
    # EnFC: NCHW flatten matches torch .view(-1, 512*7*7)
    z = jnp.transpose(h, (0, 3, 1, 2)).reshape(B, 512 * 7 * 7)
    z = matmul_bias_act(z, *q["e1"], 1024, "relu")
    z = matmul_bias_act(z, *q["e2"], 16, "relu")
    # DeFC
    z = matmul_bias_act(z, *q["d1"], 4096, "relu")
    z = matmul_bias_act(z, *q["d2"], 2048, "relu")
    # DeCNN (sub-pixel transposed convs)
    g = z.reshape(B, 128, 4, 4).transpose(0, 2, 3, 1)               # NHWC 4x4
    g = deconv2x_nhwc(g, *q["t1"], 512, "leaky_relu")               # 8x8
    g = deconv2x_nhwc(g, *q["t2"], 512, "leaky_relu")               # 16x16
    g = deconv2x_nhwc(g, *q["t3"], 512, "leaky_relu")               # 32x32
    g = deconv2x_nhwc(g, *q["t4"], 512, "leaky_relu")               # 64x64
    g = deconv2x_nhwc(g, *q["t5"], 4, "sigmoid", jnp.bfloat16)      # 128x128
    return jnp.transpose(g, (0, 3, 1, 2)).astype(jnp.float32)       # [B,1,128,128]


def init_params(key):
    """Deterministic synthetic params (PyTorch layouts, uniform init)."""
    specs = {
        "c1": (((128, 6, 5, 5), (128,)), 6 * 5 * 5),
        "c2": (((256, 128, 3, 3), (256,)), 128 * 3 * 3),
        "c3": (((512, 256, 3, 3), (512,)), 256 * 3 * 3),
        "e1": (((512 * 7 * 7, 1024), (1024,)), 512 * 7 * 7),
        "e2": (((1024, 16), (16,)), 1024),
        "d1": (((16, 4096), (4096,)), 16),
        "d2": (((4096, 2048), (2048,)), 4096),
        "t1": (((128, 128, 4, 4), (128,)), 128 * 4 * 4),
        "t2": (((128, 128, 4, 4), (128,)), 128 * 4 * 4),
        "t3": (((128, 128, 4, 4), (128,)), 128 * 4 * 4),
        "t4": (((128, 128, 4, 4), (128,)), 128 * 4 * 4),
        "t5": (((128, 1, 4, 4), (1,)), 128 * 4 * 4),
    }
    params = {}
    keys = jax.random.split(key, 2 * len(specs))
    i = 0
    for name, ((w_shape, b_shape), fan_in) in specs.items():
        bound = 1.0 / float(fan_in) ** 0.5
        params[f"{name}_w"] = jax.random.uniform(
            keys[i], w_shape, jnp.float32, -bound, bound)
        params[f"{name}_b"] = jax.random.uniform(
            keys[i + 1], b_shape, jnp.float32, -bound, bound)
        i += 2
    return params


if __name__ == "__main__":
    key = jax.random.PRNGKey(0)
    k_x, k_p = jax.random.split(key)
    # 28x28 input is the only spatial size consistent with the 512*7*7 flatten.
    x = jax.random.normal(k_x, (2, 6, 28, 28), jnp.float32)
    raw = init_params(k_p)
    params = prepare_params(raw)

    # --- sanity check: Pallas GEMM vs jnp (bf16 inputs, f32 accumulation) ---
    a = jax.random.normal(jax.random.PRNGKey(1), (37, 150), jnp.float32)
    w = jax.random.normal(jax.random.PRNGKey(2), (150, 70), jnp.float32)
    b = jax.random.normal(jax.random.PRNGKey(3), (70,), jnp.float32)
    wp, bp = prep_dense(w, b)
    got = matmul_bias_act(a, wp, bp, 70, "relu", jnp.float32)
    a_bf = a.astype(jnp.bfloat16).astype(jnp.float32)
    w_bf = w.astype(jnp.bfloat16).astype(jnp.float32)
    ref = jnp.maximum(a_bf @ w_bf + b, 0.0)
    assert float(jnp.max(jnp.abs(got - ref))) < 1e-2 * (1.0 + float(jnp.max(jnp.abs(ref))))

    # --- sanity check: sub-pixel deconv vs lax.conv_general_dilated ---------
    xt = jax.random.normal(jax.random.PRNGKey(4), (1, 5, 5, 8), jnp.float32)   # NHWC
    wt = jax.random.normal(jax.random.PRNGKey(5), (8, 5, 4, 4), jnp.float32)   # [Cin,Cout,4,4]
    bt = jax.random.normal(jax.random.PRNGKey(6), (5,), jnp.float32)
    wpt, bpt = prep_deconv(wt, bt)
    got_d = deconv2x_nhwc(xt, wpt, bpt, 4 * 5, "leaky_relu", jnp.float32)
    x_nchw = xt.astype(jnp.bfloat16).astype(jnp.float32).transpose(0, 3, 1, 2)
    w_ref = jnp.flip(wt.astype(jnp.bfloat16).astype(jnp.float32), (2, 3)).transpose(1, 0, 2, 3)
    ref_d = jax.lax.conv_general_dilated(
        x_nchw, w_ref, window_strides=(1, 1), padding=((2, 2), (2, 2)),
        lhs_dilation=(2, 2), dimension_numbers=("NCHW", "OIHW", "NCHW"))
    ref_d = ref_d + bt[None, :, None, None]
    ref_d = jnp.where(ref_d > 0, ref_d, 0.01 * ref_d).transpose(0, 2, 3, 1)
    assert got_d.shape == ref_d.shape == (1, 10, 10, 5)
    assert float(jnp.max(jnp.abs(got_d - ref_d))) < 1e-2 * (1.0 + float(jnp.max(jnp.abs(ref_d))))

    # --- full forward -------------------------------------------------------
    out = autoencoder_forward(x, params)
    out = jax.block_until_ready(out)
    assert out.shape == (2, 1, 128, 128)
    assert bool(jnp.all((out >= 0.0) & (out <= 1.0)))
    print("KERNEL_OK")
</pallas_src>

<mosaic_0001>
module attributes {stable_mosaic.version = 11 : i64} {
  func.func @_mm_kernel_single(%arg0: i32, %arg1: i32, %arg2: memref<48x256xbf16, #tpu.memory_space<vmem>>, %arg3: memref<256x128xbf16, #tpu.memory_space<vmem>>, %arg4: memref<1x128xf32, #tpu.memory_space<vmem>>, %arg5: memref<48x128xf32, #tpu.memory_space<vmem>>) attributes {dimension_semantics = [#tpu.dimension_semantics<parallel>, #tpu.dimension_semantics<parallel>], iteration_bounds = array<i64: 1, 1>, scalar_prefetch = 0 : i64, scratch_operands = 0 : i64, tpu.core_type = #tpu.core_type<tc>, window_params = [{transform_indices = @transform_0, window_bounds = array<i64: 48, 256>}, {transform_indices = @transform_1, window_bounds = array<i64: 256, 128>}, {transform_indices = @transform_2, window_bounds = array<i64: 1, 128>}, {transform_indices = @transform_3, window_bounds = array<i64: 48, 128>}]} {
    %c0 = arith.constant 0 : index
    %c0_0 = arith.constant 0 : index
    %0 = vector.load %arg2[%c0, %c0_0] : memref<48x256xbf16, #tpu.memory_space<vmem>>, vector<48x256xbf16>
    %c0_1 = arith.constant 0 : index
    %c0_2 = arith.constant 0 : index
    %1 = vector.load %arg3[%c0_1, %c0_2] : memref<256x128xbf16, #tpu.memory_space<vmem>>, vector<256x128xbf16>
    %cst = arith.constant dense<0.000000e+00> : vector<48x128xf32>
    %2 = tpu.matmul %0, %1, %cst {dimension_numbers = #tpu.dot_dimension_numbers<[1], [0], [0], [1], [0, 0, 1, 1], [], []>} : vector<48x256xbf16>, vector<256x128xbf16>, vector<48x128xf32> -> vector<48x128xf32>
    %c0_3 = arith.constant 0 : index
    %c0_4 = arith.constant 0 : index
    %3 = vector.load %arg4[%c0_3, %c0_4] : memref<1x128xf32, #tpu.memory_space<vmem>>, vector<1x128xf32>
    %4 = vector.broadcast %3 : vector<1x128xf32> to vector<48x128xf32>
    %5 = arith.addf %2, %4 : vector<48x128xf32>
    %cst_5 = arith.constant 0.000000e+00 : f32
    %6 = vector.broadcast %cst_5 : f32 to vector<48x128xf32>
    %7 = arith.maximumf %5, %6 : vector<48x128xf32>
    %c0_6 = arith.constant 0 : index
    %c0_7 = arith.constant 0 : index
    %8 = vector.load %arg5[%c0_6, %c0_7] : memref<48x128xf32, #tpu.memory_space<vmem>>, vector<48x128xf32>
    tpu.vector_store %arg5[%c0_6, %c0_7], %7 {strides = array<i32>} : memref<48x128xf32, #tpu.memory_space<vmem>>, vector<48x128xf32>,
    return
  }
  func.func @transform_0(%arg0: i32, %arg1: i32) -> (i32, i32) {
    %c0_i32 = arith.constant 0 : i32
    %c0_i32_0 = arith.constant 0 : i32
    return %arg0, %c0_i32 : i32, i32
  }
  func.func @transform_1(%arg0: i32, %arg1: i32) -> (i32, i32) {
    %c0_i32 = arith.constant 0 : i32
    %c0_i32_0 = arith.constant 0 : i32
    return %c0_i32, %arg1 : i32, i32
  }
  func.func @transform_2(%arg0: i32, %arg1: i32) -> (i32, i32) {
    %c0_i32 = arith.constant 0 : i32
    %c0_i32_0 = arith.constant 0 : i32
    return %c0_i32, %arg1 : i32, i32
  }
  func.func @transform_3(%arg0: i32, %arg1: i32) -> (i32, i32) {
    %c0_i32 = arith.constant 0 : i32
    return %arg0, %arg1 : i32, i32
  }
}

</mosaic_0001>

<bundles_post_ra>
// kernel: tpu_custom_call.1
= control target key start
LH: loop header
LB: loop body
LE: loop exit
PB: predicated region body
PF: predicated region fallthrough
CT: control target
= control target key end

     0   :  { %8 = vsyncpa [#allocation3], 0  ;;  %s551_s0 = inlined_call_operand.hbm [shape: bf16[48,256], index: 0, kind: input, shape index: {}]   ;;  %s552_s1 = inlined_call_operand.hbm [shape: bf16[256,128], index: 1, kind: input, shape index: {}]   ;;  %s553_s2 = inlined_call_operand.vmem [shape: f32[1,128], index: 2, kind: input, shape index: {}]   ;;  %s554_s3 = inlined_call_operand.hbm [shape: f32[48,128], index: 3, kind: output, shape index: {}]  }
   0x1   :  { %9 = vsyncpa [#allocation6], 0 }
   0x2   :  { %10 = vsyncpa [#allocation4], 0  ;;  %s479_s12 = smov [#allocation2]   ;;  %s407_s16 = scalar_lea.hbm %s551_s0, 768 }
   0x3   :  { %s16_s13 = sshll.u32 %s479_s12, 4  ;;  %p408_p0 = scmp.ne.s32.totalorder %s551_s0, %s407_s16  ;;  %s17_s13 = int_to_ptr.vmem [resolvable:$true] %s16_s13 }
   0x4   :  { %p411_p1 = scmp.lt.u32.totalorder %s407_s16, %s551_s0 }
   0x6   :  { %p413_p2 = pnand %p411_p1, %p408_p0 }
   0x8   :  { %416 = shalt.err (!%p413_p2)
}
   0x9   :  { %s417_s21 = scalar_lea.vmem %s17_s13, 768  ;;  %p422_p4 = scmp.lt.s32.totalorder %s17_s13, %s17_s13 }
   0xa   :  { %p418_p3 = scmp.ne.s32.totalorder %s17_s13, %s417_s21  ;;  %p423_p5 = scmp.lt.s32.totalorder %s417_s21, %s417_s21 }
   0xc   :  { %p424_p6 = por %p423_p5, %p422_p4 }
   0xe   :  { %p425_p7 = pnand %p424_p6, %p418_p3 }
  0x10   :  { %428 = shalt.err (!%p425_p7)
}
  0x11   :  { %s480_s22 = smov 128   ;;  %s481_s23 = smov 8  }
  0x12   :  { %22 = dma.hbm_to_vmem [thread:$0]  %s551_s0, 768, %s17_s13, [#allocation3], %s480_s22, %s480_s22, %s481_s23  }
  0x13   :  { %s482_s26 = smov [#allocation5]   ;;  %s429_s30 = scalar_lea.hbm %s552_s1, 2048 }
  0x14   :  { %s28_s27 = sshll.u32 %s482_s26, 4  ;;  %p430_p8 = scmp.ne.s32.totalorder %s552_s1, %s429_s30  ;;  %s29_s27 = int_to_ptr.vmem [resolvable:$true] %s28_s27 }
  0x15   :  { %p433_p9 = scmp.lt.u32.totalorder %s429_s30, %s552_s1 }
  0x17   :  { %p435_p10 = pnand %p433_p9, %p430_p8 }
  0x19   :  { %438 = shalt.err (!%p435_p10)
}
  0x1a   :  { %s439_s8 = scalar_lea.vmem %s29_s27, 2048  ;;  %p444_p12 = scmp.lt.s32.totalorder %s29_s27, %s29_s27 }
  0x1b   :  { %p440_p11 = scmp.ne.s32.totalorder %s29_s27, %s439_s8  ;;  %p445_p13 = scmp.lt.s32.totalorder %s439_s8, %s439_s8 }
  0x1d   :  { %p446_p0 = por %p445_p13, %p444_p12 }
  0x1f   :  { %p447_p1 = pnand %p446_p0, %p440_p11 }
  0x21   :  { %450 = shalt.err (!%p447_p1)
}
  0x22   :  { %s483_s0 = smov 64   ;;  %s484_s9 = smov 4  }
  0x23   :  { %34 = dma.hbm_to_vmem [thread:$0]  %s552_s1, 2048, %s29_s27, [#allocation6], %s483_s0, %s483_s0, %s484_s9  }
  0x24   :  { %473 = dma.done.wait [#allocation3], 768  }
  0x25   :  { %474 = vsyncadd [#allocation3], 4294966528 }
  0x26   :  { %475 = dma.done.wait [#allocation6], 2048  }
  0x27   :  { %476 = vsyncadd [#allocation6], 4294965248  ;;  %v382_v0 = vld [vmem:[#allocation5 + $0x40] sm:$0xff]   ;;  %v384_v2 = vld [vmem:[#allocation5 + $0x48] sm:$0xff]  }
  0x28   :  { %v383_v1 = vld [vmem:[#allocation5] sm:$0xff]   ;;  %359 = vmatprep.subr.bf16.mxu1 %v382_v0  ;;  %325 = vmatprep.subr.bf16.mxu0 %v382_v0  ;;  %v385_v3 = vld [vmem:[#allocation5 + $0x8] sm:$0xff]   ;;  %v386_v4 = vld [vmem:[#allocation5 + $0x50] sm:$0xff]  }
  0x29   :  { %367 = vmatpush3.bf16.msra.mxu1 %v383_v1  ;;  %326 = vmatpush3.bf16.msra.mxu0 %v383_v1  ;;  %v387_v5 = vld [vmem:[#allocation5 + $0x10] sm:$0xff]   ;;  %v388_v6 = vld [vmem:[#allocation5 + $0x58] sm:$0xff]   ;;  %v390_v8 = vld [vmem:[#allocation5 + $0x60] sm:$0xff]  }
  0x2a   :  { %360 = vmatprep.subr.bf16.mxu1 %v384_v2  ;;  %327 = vmatprep.subr.bf16.mxu0 %v384_v2  ;;  %v389_v7 = vld [vmem:[#allocation5 + $0x18] sm:$0xff]   ;;  %v391_v9 = vld [vmem:[#allocation5 + $0x20] sm:$0xff]   ;;  %v392_v10 = vld [vmem:[#allocation5 + $0x68] sm:$0xff]  }
  0x2b   :  { %v400_v11 = vld [vmem:[#allocation2 + $0x14] ss:$8 sps:$4 sm:$0xff]   ;;  %v403_v12 = vld [vmem:[#allocation2 + $0x4] ss:$8 sps:$4 sm:$0xff]   ;;  %v398_v18 = vld [vmem:[#allocation2 + $0x10] ss:$8 sps:$4 sm:$0xff]  }
  0x2c   :  { %v393_v13 = vld [vmem:[#allocation5 + $0x28] sm:$0xff]   ;;  %v394_v14 = vld [vmem:[#allocation5 + $0x70] sm:$0xff]   ;;  %255 = vmatprep.mubr.bf16.mxu1 %v400_v11  ;;  %247 = vmatprep.mubr.bf16.mxu0 %v403_v12  ;;  %v396_v16 = vld [vmem:[#allocation5 + $0x78] sm:$0xff]  }
  0x2d   :  { %368 = vmatpush3.bf16.msra.mxu1 %v385_v3  ;;  %328 = vmatpush3.bf16.msra.mxu0 %v385_v3  ;;  %v395_v15 = vld [vmem:[#allocation5 + $0x30] sm:$0xff]   ;;  %v397_v17 = vld [vmem:[#allocation5 + $0x38] sm:$0xff]  }
  0x2e   :  { %361 = vmatprep.subr.bf16.mxu1 %v386_v4  ;;  %329 = vmatprep.subr.bf16.mxu0 %v386_v4  ;;  %v401_v19 = vld [vmem:[#allocation2] ss:$8 sps:$4 sm:$0xff]   ;;  %v404_v20 = vld [vmem:[#allocation2 + $0x24] ss:$8 sps:$4 sm:$0xff]  }
  0x2f   :  { %v406_v21 = vld [vmem:[#allocation2 + $0x20] ss:$8 sps:$4 sm:$0xff]  }
  0x30   :  { %v302_v24 = vld [vmem:[%s553_s2] ss:$0 sm:$0xff]  ;;  %s485_s2 = smov [#allocation7]  }
  0x31   :  { %369 = vmatpush3.bf16.msra.mxu1 %v387_v5  ;;  %330 = vmatpush3.bf16.msra.mxu0 %v387_v5  ;;  %s289_s13 = sshll.u32 %s485_s2, 4  ;;  %s290_s13 = int_to_ptr.vmem [resolvable:$true] %s289_s13 }
  0x32   :  { %362 = vmatprep.subr.bf16.mxu1 %v388_v6  ;;  %331 = vmatprep.subr.bf16.mxu0 %v388_v6  ;;  %s451_s14 = scalar_lea.vmem %s290_s13, 768  ;;  %p456_p3 = scmp.lt.s32.totalorder %s290_s13, %s290_s13 }
  0x33   :  { %p452_p2 = scmp.ne.s32.totalorder %s290_s13, %s451_s14  ;;  %p457_p4 = scmp.lt.s32.totalorder %s451_s14, %s451_s14 }
  0x35   :  { %370 = vmatpush3.bf16.msra.mxu1 %v389_v7  ;;  %332 = vmatpush3.bf16.msra.mxu0 %v389_v7  ;;  %p458_p5 = por %p457_p4, %p456_p3 }
  0x36   :  { %363 = vmatprep.subr.bf16.mxu1 %v390_v8  ;;  %333 = vmatprep.subr.bf16.mxu0 %v390_v8 }
  0x37   :  { %p459_p6 = pnand %p458_p5, %p452_p2 }
  0x39   :  { %371 = vmatpush3.bf16.msra.mxu1 %v391_v9  ;;  %334 = vmatpush3.bf16.msra.mxu0 %v391_v9 }
  0x3a   :  { %364 = vmatprep.subr.bf16.mxu1 %v392_v10  ;;  %335 = vmatprep.subr.bf16.mxu0 %v392_v10 }
  0x3d   :  { %372 = vmatpush3.bf16.msra.mxu1 %v393_v13  ;;  %336 = vmatpush3.bf16.msra.mxu0 %v393_v13 }
  0x3e   :  { %365 = vmatprep.subr.bf16.mxu1 %v394_v14  ;;  %337 = vmatprep.subr.bf16.mxu0 %v394_v14 }
  0x41   :  { %373 = vmatpush3.bf16.msra.mxu1 %v395_v15  ;;  %338 = vmatpush3.bf16.msra.mxu0 %v395_v15 }
  0x42   :  { %366 = vmatprep.subr.bf16.mxu1 %v396_v16  ;;  %339 = vmatprep.subr.bf16.mxu0 %v396_v16 }
  0x45   :  { %374 = vmatpush3.bf16.msra.mxu1 %v397_v17  ;;  %340 = vmatpush3.bf16.msra.mxu0 %v397_v17 }
  0x48   :  { %256 = vmatmul.mubr.bf16.vlgmr.msra.gmra.mrb[0].mxu1 %v398_v18  ;;  %248 = vmatmul.mubr.bf16.vlgmr.msra.gmra.mrb[0].mxu0 %v401_v19 }
  0x49   :  { %263 = vmatprep.mubr.bf16.mxu1 %v404_v20 }
  0x50   :  { %264 = vmatmul.mubr.bf16.gmra.mrb[4].mxu1 %v406_v21 }
 0x11b   :  { %v347_v22 = vpop.f32.mrb[0].mxu1  ;;  %v341_v23 = vpop.f32.mrb[0].mxu0 }
 0x11c   :  { %v348_v25 = vpop.f32.mrb[1].mxu1  ;;  %v342_v26 = vpop.f32.mrb[1].mxu0 }
 0x11d   :  { %v349_v27 = vadd.f32 %v348_v25, %v347_v22  ;;  %v350_v28 = vpop.f32.mrb[2].mxu1  ;;  %v343_v29 = vadd.f32 %v342_v26, %v341_v23  ;;  %v344_v30 = vpop.f32.mrb[2].mxu0 }
 0x11e   :  { %v351_v31 = vpop.f32.mrb[3].mxu1  ;;  %v345_v32 = vpop.f32.mrb[3].mxu0 }
 0x11f   :  { %v258_v33 = vadd.f32 %v349_v27, %v302_v24  ;;  %v352_v34 = vadd.f32 %v351_v31, %v350_v28  ;;  %v250_v35 = vadd.f32 %v343_v29, %v302_v24  ;;  %v346_v36 = vadd.f32 %v345_v32, %v344_v30 }
 0x121   :  { %v274_v37 = vmax.f32 %v258_v33, 0.0  ;;  %v261_v38 = vadd.f32 %v352_v34, %v302_v24  ;;  %v272_v39 = vmax.f32 %v250_v35, 0.0  ;;  %v253_v40 = vadd.f32 %v346_v36, %v302_v24 }
 0x123   :  { %280 = vst [vmem:[#allocation7 + $0x10] sm:$0xff] %v274_v37  ;;  %v275_v41 = vmax.f32 %v261_v38, 0.0  ;;  %278 = vst [vmem:[#allocation7] sm:$0xff] %v272_v39  ;;  %v273_v42 = vmax.f32 %v253_v40, 0.0  ;;  %v353_v43 = vpop.f32.mrb[4].mxu1 }
 0x124   :  { %v354_v44 = vpop.f32.mrb[5].mxu1 }
 0x125   :  { %281 = vst [vmem:[#allocation7 + $0x18] sm:$0xff] %v275_v41  ;;  %279 = vst [vmem:[#allocation7 + $0x8] sm:$0xff] %v273_v42  ;;  %v355_v45 = vadd.f32 %v354_v44, %v353_v43  ;;  %v356_v46 = vpop.f32.mrb[6].mxu1 }
 0x126   :  { %v357_v47 = vpop.f32.mrb[7].mxu1 }
 0x127   :  { %v266_v48 = vadd.f32 %v355_v45, %v302_v24  ;;  %v358_v49 = vadd.f32 %v357_v47, %v356_v46 }
 0x129   :  { %v276_v50 = vmax.f32 %v266_v48, 0.0  ;;  %v269_v51 = vadd.f32 %v358_v49, %v302_v24 }
 0x12b   :  { %282 = vst [vmem:[#allocation7 + $0x20] sm:$0xff] %v276_v50  ;;  %v277_v52 = vmax.f32 %v269_v51, 0.0 }
 0x12d   :  { %283 = vst [vmem:[#allocation7 + $0x28] sm:$0xff] %v277_v52 }
 0x12e   :  { %462 = shalt.err (!%p459_p6)
}
 0x12f   :  { %s463_s17 = scalar_lea.hbm %s554_s3, 768 }
 0x130   :  { %p464_p7 = scmp.ne.s32.totalorder %s554_s3, %s463_s17  ;;  %p467_p8 = scmp.lt.u32.totalorder %s463_s17, %s554_s3 }
 0x132   :  { %p469_p9 = pnand %p467_p8, %p464_p7 }
 0x134   :  { %472 = shalt.err (!%p469_p9)
}
 0x135   :  { %295 = dma.vmem_to_hbm [thread:$0]  %s290_s13, 768, %s554_s3, [#allocation4], %s480_s22, %s480_s22, %s481_s23  }
 0x136   :  { %477 = dma.done.wait [#allocation4], 768  }
 0x137   :  { %478 = vsyncadd [#allocation4], 4294966528 }
 0x138   :  { %299 = vsyncpa [#allocation3], 1 }
 0x139   :  { %300 = vsyncpa [#allocation6], 1 }
 0x13a   :  { %301 = vsyncpa [#allocation4], 1 }

</bundles_post_ra>
